<compile_context>
chip_gen: v5e
topology: v5e:2x2
jax: 0.10.0
libtpu: 0.0.40
codegen_flags: <defaults>
</compile_context>

<pallas_src>
import jax
import jax.numpy as jnp
from jax.experimental import pallas as pl
from jax.experimental.pallas import tpu as pltpu


def _lingo_cosine_kernel(eta_ref, inv_ref, x_ref, w_ref, logits_ref, scaled_ref):
    # eta_ref:    [1, 1]  f32 in SMEM (learnable temperature)
    # inv_ref:    [1, TC] f32 precomputed 1/max(||w_c||, 1e-12)
    # x_ref:      [TB, TK] features tile (native dtype)
    # w_ref:      [TC, TK] class-embedding tile (native dtype)
    # logits_ref: [TB, TC] f32 output; doubles as the K accumulator
    # scaled_ref: [TB, TC] f32 output
    k = pl.program_id(2)

    @pl.when(k == 0)
    def _init():
        logits_ref[...] = jnp.zeros_like(logits_ref)

    # Un-normalized logits: contract the feature axis of both tiles directly
    # (no .T / XLU relayout), f32 accumulate on the MXU into the resident
    # output block.
    logits_ref[...] += jax.lax.dot_general(
        x_ref[...], w_ref[...], (((1,), (1,)), ((), ())),
        preferred_element_type=jnp.float32)

    @pl.when(k == pl.num_programs(2) - 1)
    def _finalize():
        logits = logits_ref[...] * inv_ref[...]       # [TB, TC] * [1, TC]
        logits_ref[...] = logits
        scaled_ref[...] = eta_ref[0, 0] * logits


def _round_up(x, m):
    return ((x + m - 1) // m) * m


def lingo_cosine_classifier(normalized_features, class_embeddings, eta,
                            *, tb=512, tc=1024, tk=1024, compute_dtype=None):
    """Forward of LingoCosineClassifier.

    Args:
      normalized_features: [B, D] already L2-normalized features (as in torch).
      class_embeddings:    [C, D] concatenated class embeddings (Linear weight).
      eta:                 [1] learnable temperature.
      compute_dtype:       optional dtype (e.g. jnp.bfloat16) to cast the matmul
                           operands to; accumulation stays f32.
    Returns:
      (logits, scaled_output), each [B, C] float32.
    """
    B, D = normalized_features.shape
    C, D2 = class_embeddings.shape
    assert D == D2, "in_features mismatch"

    x = normalized_features
    w = class_embeddings
    if compute_dtype is not None:
        x = x.astype(compute_dtype)
        w = w.astype(compute_dtype)

    # Per-class inverse L2 norm, computed once in f32.  Matches torch
    # F.normalize(p=2, dim=-1, eps=1e-12): w / max(||w||, 1e-12).
    w_f32 = class_embeddings.astype(jnp.float32)
    norm = jnp.sqrt(jnp.sum(w_f32 * w_f32, axis=-1))      # [C]
    inv_norm = 1.0 / jnp.maximum(norm, 1e-12)             # [C]

    # Tile sizes, clipped to the hardware-aligned problem size.  Prefer the
    # full (padded) batch in one tile so W is streamed from HBM exactly once.
    TB = min(tb, _round_up(B, 8))
    TC = min(tc, _round_up(C, 128))
    TK = min(tk, _round_up(D, 128))
    Bp = _round_up(B, TB)

    # v7x has 2 TensorCores per chip: if the whole batch fits one TB tile,
    # split C so at least two "parallel" blocks exist (harmless on v5e/v6e).
    if Bp // TB == 1 and C > 128:
        tc_split = _round_up((C + 1) // 2, 128)
        TC = min(TC, tc_split)

    Cp = _round_up(C, TC)
    Dp = _round_up(D, TK)

    if (Bp, Dp) != (B, D):
        x = jnp.pad(x, ((0, Bp - B), (0, Dp - D)))
    if (Cp, Dp) != (C, D):
        w = jnp.pad(w, ((0, Cp - C), (0, Dp - D)))
    # Padded classes: norm=0 -> inv=1e12, but their accumulated logits are 0,
    # so 0 * 1e12 = 0 and they are sliced off below.
    inv_norm_p = jnp.pad(inv_norm, (0, Cp - C)).reshape(1, Cp)

    eta_2d = jnp.reshape(eta, (1, 1)).astype(jnp.float32)

    grid = (Bp // TB, Cp // TC, Dp // TK)

    # VMEM footprint: double-buffered x / w tiles, two resident f32 output
    # tiles (double-buffered), plus the inv_norm row.  Cap at 48 MiB so the
    # same config also fits v7x's 64 MiB physical VMEM.
    need = (2 * TB * TK * x.dtype.itemsize
            + 2 * TC * TK * w.dtype.itemsize
            + 2 * 2 * TB * TC * 4
            + 2 * TC * 4)
    vmem_limit = int(min(max(32 * 1024 * 1024, need + (8 << 20)),
                         48 * 1024 * 1024))

    logits_p, scaled_p = pl.pallas_call(
        _lingo_cosine_kernel,
        out_shape=(
            jax.ShapeDtypeStruct((Bp, Cp), jnp.float32),
            jax.ShapeDtypeStruct((Bp, Cp), jnp.float32),
        ),
        grid_spec=pltpu.PrefetchScalarGridSpec(
            num_scalar_prefetch=0,
            grid=grid,
            in_specs=[
                pl.BlockSpec(memory_space=pltpu.SMEM),            # eta scalar
                pl.BlockSpec((1, TC), lambda i, j, k: (0, j)),    # 1/||w_c||
                pl.BlockSpec((TB, TK), lambda i, j, k: (i, k)),   # features
                pl.BlockSpec((TC, TK), lambda i, j, k: (j, k)),   # class embeddings
            ],
            out_specs=(
                pl.BlockSpec((TB, TC), lambda i, j, k: (i, j)),
                pl.BlockSpec((TB, TC), lambda i, j, k: (i, j)),
            ),
        ),
        compiler_params=pltpu.CompilerParams(
            dimension_semantics=("parallel", "parallel", "arbitrary"),
            vmem_limit_bytes=vmem_limit,
        ),
    )(eta_2d, inv_norm_p, x, w)

    if (Bp, Cp) != (B, C):
        logits_p = logits_p[:B, :C]
        scaled_p = scaled_p[:B, :C]
    return logits_p, scaled_p


def _reference(normalized_features, class_embeddings, eta):
    w = class_embeddings.astype(jnp.float32)
    norm = jnp.sqrt(jnp.sum(w * w, axis=-1, keepdims=True))
    w_n = w / jnp.maximum(norm, 1e-12)
    logits = jnp.dot(normalized_features.astype(jnp.float32), w_n.T,
                     precision=jax.lax.Precision.HIGHEST)
    return logits, eta.astype(jnp.float32) * logits


if __name__ == "__main__":
    key = jax.random.PRNGKey(0)
    k1, k2 = jax.random.split(key)

    B = 8              # batch
    in_features = 32
    out_features = 16

    # Deterministic synthetic "parameters"; the module's forward expects
    # already-normalized features, so normalize here.
    feats = jax.random.normal(k1, (B, in_features), dtype=jnp.float32)
    feats = feats / jnp.linalg.norm(feats, axis=-1, keepdims=True)

    cls_embeddings = jax.random.normal(
        k2, (out_features, in_features), dtype=jnp.float32)
    eta = jnp.array([1.5], dtype=jnp.float32)  # learnable temperature (init 1.0 in torch)

    logits, scaled = lingo_cosine_classifier(feats, cls_embeddings, eta)
    jax.block_until_ready((logits, scaled))

    ref_logits, ref_scaled = _reference(feats, cls_embeddings, eta)
    assert logits.shape == (B, out_features) and scaled.shape == (B, out_features)
    assert jnp.allclose(logits, ref_logits, atol=1e-4, rtol=1e-4)
    assert jnp.allclose(scaled, ref_scaled, atol=1e-4, rtol=1e-4)

    print("KERNEL_OK")
</pallas_src>

<mosaic_0001>
module attributes {stable_mosaic.version = 11 : i64} {
  func.func @_lingo_cosine_kernel(%arg0: i32, %arg1: i32, %arg2: i32, %arg3: memref<1x1xf32, #tpu.memory_space<smem>>, %arg4: memref<1x128xf32, #tpu.memory_space<vmem>>, %arg5: memref<8x128xf32, #tpu.memory_space<vmem>>, %arg6: memref<128x128xf32, #tpu.memory_space<vmem>>, %arg7: memref<8x128xf32, #tpu.memory_space<vmem>>, %arg8: memref<8x128xf32, #tpu.memory_space<vmem>>) attributes {dimension_semantics = [#tpu.dimension_semantics<parallel>, #tpu.dimension_semantics<parallel>, #tpu.dimension_semantics<arbitrary>], iteration_bounds = array<i64: 1, 1, 1>, scalar_prefetch = 0 : i64, scratch_operands = 0 : i64, tpu.core_type = #tpu.core_type<tc>, window_params = [{transform_indices = @transform_0, window_bounds = array<i64: 1, 1>}, {transform_indices = @transform_1, window_bounds = array<i64: 1, 128>}, {transform_indices = @transform_2, window_bounds = array<i64: 8, 128>}, {transform_indices = @transform_3, window_bounds = array<i64: 128, 128>}, {transform_indices = @transform_4, window_bounds = array<i64: 8, 128>}, {transform_indices = @transform_5, window_bounds = array<i64: 8, 128>}]} {
    %c0_i32 = arith.constant 0 : i32
    %0 = arith.cmpi eq, %arg2, %c0_i32 : i32
    %1 = arith.extui %0 : i1 to i32
    %c0_i32_0 = arith.constant 0 : i32
    %2 = arith.cmpi ne, %1, %c0_i32_0 : i32
    scf.if %2 {
      %cst_10 = arith.constant 0.000000e+00 : f32
      %12 = vector.broadcast %cst_10 : f32 to vector<8x128xf32>
      %c0_11 = arith.constant 0 : index
      %c0_12 = arith.constant 0 : index
      %13 = vector.load %arg7[%c0_11, %c0_12] : memref<8x128xf32, #tpu.memory_space<vmem>>, vector<8x128xf32>
      tpu.vector_store %arg7[%c0_11, %c0_12], %12 {strides = array<i32>} : memref<8x128xf32, #tpu.memory_space<vmem>>, vector<8x128xf32>,
    } else {
    }
    %c0 = arith.constant 0 : index
    %c0_1 = arith.constant 0 : index
    %3 = vector.load %arg7[%c0, %c0_1] : memref<8x128xf32, #tpu.memory_space<vmem>>, vector<8x128xf32>
    %c0_2 = arith.constant 0 : index
    %c0_3 = arith.constant 0 : index
    %4 = vector.load %arg5[%c0_2, %c0_3] : memref<8x128xf32, #tpu.memory_space<vmem>>, vector<8x128xf32>
    %c0_4 = arith.constant 0 : index
    %c0_5 = arith.constant 0 : index
    %5 = vector.load %arg6[%c0_4, %c0_5] : memref<128x128xf32, #tpu.memory_space<vmem>>, vector<128x128xf32>
    %cst = arith.constant dense<0.000000e+00> : vector<8x128xf32>
    %6 = tpu.matmul %4, %5, %cst {dimension_numbers = #tpu.dot_dimension_numbers<[1], [1], [0], [0], [0, 0, 1, 0], [], []>} : vector<8x128xf32>, vector<128x128xf32>, vector<8x128xf32> -> vector<8x128xf32>
    %7 = arith.addf %3, %6 : vector<8x128xf32>
    %c0_6 = arith.constant 0 : index
    %c0_7 = arith.constant 0 : index
    %8 = vector.load %arg7[%c0_6, %c0_7] : memref<8x128xf32, #tpu.memory_space<vmem>>, vector<8x128xf32>
    tpu.vector_store %arg7[%c0_6, %c0_7], %7 {strides = array<i32>} : memref<8x128xf32, #tpu.memory_space<vmem>>, vector<8x128xf32>,
    %c0_i32_8 = arith.constant 0 : i32
    %9 = arith.cmpi eq, %arg2, %c0_i32_8 : i32
    %10 = arith.extui %9 : i1 to i32
    %c0_i32_9 = arith.constant 0 : i32
    %11 = arith.cmpi ne, %10, %c0_i32_9 : i32
    scf.if %11 {
      %c0_10 = arith.constant 0 : index
      %c0_11 = arith.constant 0 : index
      %12 = vector.load %arg7[%c0_10, %c0_11] : memref<8x128xf32, #tpu.memory_space<vmem>>, vector<8x128xf32>
      %c0_12 = arith.constant 0 : index
      %c0_13 = arith.constant 0 : index
      %13 = vector.load %arg4[%c0_12, %c0_13] : memref<1x128xf32, #tpu.memory_space<vmem>>, vector<1x128xf32>
      %14 = vector.broadcast %13 : vector<1x128xf32> to vector<8x128xf32>
      %15 = arith.mulf %12, %14 : vector<8x128xf32>
      %c0_14 = arith.constant 0 : index
      %c0_15 = arith.constant 0 : index
      %16 = vector.load %arg7[%c0_14, %c0_15] : memref<8x128xf32, #tpu.memory_space<vmem>>, vector<8x128xf32>
      tpu.vector_store %arg7[%c0_14, %c0_15], %15 {strides = array<i32>} : memref<8x128xf32, #tpu.memory_space<vmem>>, vector<8x128xf32>,
      %c0_16 = arith.constant 0 : index
      %c0_17 = arith.constant 0 : index
      %17 = memref.load %arg3[%c0_16, %c0_17] : memref<1x1xf32, #tpu.memory_space<smem>>
      %18 = vector.broadcast %17 : f32 to vector<8x128xf32>
      %19 = arith.mulf %18, %15 : vector<8x128xf32>
      %c0_18 = arith.constant 0 : index
      %c0_19 = arith.constant 0 : index
      %20 = vector.load %arg8[%c0_18, %c0_19] : memref<8x128xf32, #tpu.memory_space<vmem>>, vector<8x128xf32>
      tpu.vector_store %arg8[%c0_18, %c0_19], %19 {strides = array<i32>} : memref<8x128xf32, #tpu.memory_space<vmem>>, vector<8x128xf32>,
    } else {
    }
    return
  }
  func.func @transform_0(%arg0: i32, %arg1: i32, %arg2: i32) -> (i32, i32) {
    %c0_i32 = arith.constant 0 : i32
    %c0_i32_0 = arith.constant 0 : i32
    %c0_i32_1 = arith.constant 0 : i32
    return %c0_i32, %c0_i32_0 : i32, i32
  }
  func.func @transform_1(%arg0: i32, %arg1: i32, %arg2: i32) -> (i32, i32) {
    %c0_i32 = arith.constant 0 : i32
    %c0_i32_0 = arith.constant 0 : i32
    return %c0_i32, %arg1 : i32, i32
  }
  func.func @transform_2(%arg0: i32, %arg1: i32, %arg2: i32) -> (i32, i32) {
    %c0_i32 = arith.constant 0 : i32
    return %arg0, %arg2 : i32, i32
  }
  func.func @transform_3(%arg0: i32, %arg1: i32, %arg2: i32) -> (i32, i32) {
    %c0_i32 = arith.constant 0 : i32
    return %arg1, %arg2 : i32, i32
  }
  func.func @transform_4(%arg0: i32, %arg1: i32, %arg2: i32) -> (i32, i32) {
    %c0_i32 = arith.constant 0 : i32
    return %arg0, %arg1 : i32, i32
  }
  func.func @transform_5(%arg0: i32, %arg1: i32, %arg2: i32) -> (i32, i32) {
    %c0_i32 = arith.constant 0 : i32
    return %arg0, %arg1 : i32, i32
  }
}

</mosaic_0001>

<bundles_post_ra>
// kernel: tpu_custom_call.1
= control target key start
LH: loop header
LB: loop body
LE: loop exit
PB: predicated region body
PF: predicated region fallthrough
CT: control target
= control target key end

     0   :  { %12 = vsyncpa [#allocation4], 0  ;;  %s311_s0 = inlined_call_operand.<no memory space> [shape: f32[1,1], index: 0, kind: input, shape index: {}]   ;;  %s312_s1 = inlined_call_operand.vmem [shape: f32[1,128], index: 1, kind: input, shape index: {}]   ;;  %s313_s2 = inlined_call_operand.hbm [shape: f32[8,128], index: 2, kind: input, shape index: {}]   ;;  %s314_s3 = inlined_call_operand.hbm [shape: f32[128,128], index: 3, kind: input, shape index: {}]   ;;  %s315_s4 = inlined_call_operand.hbm [shape: f32[8,128], index: 4, kind: output, shape index: {0}]   ;;  %s316_s5 = inlined_call_operand.hbm [shape: f32[8,128], index: 5, kind: output, shape index: {1}]  }
   0x1   :  { %13 = vsyncpa [#allocation7], 0 }
   0x2   :  { %14 = vsyncpa [#allocation5], 0 }
   0x3   :  { %15 = vsyncpa [#allocation10], 0  ;;  %s25_s20 = sshll.u32 %s313_s2, 4  ;;  %s257_s21 = smov [#allocation3]   ;;  %s26_s20 = int_to_ptr.hbm [resolvable:$true] %s25_s20 }
   0x4   :  { %s27_s22 = sshll.u32 %s257_s21, 4  ;;  %s35_s25 = sshll.u32 %s314_s3, 4  ;;  %s28_s22 = int_to_ptr.vmem [resolvable:$true] %s27_s22  ;;  %s36_s25 = int_to_ptr.hbm [resolvable:$true] %s35_s25 }
   0x5   :  { %30 = dma.hbm_to_vmem [thread:$0]  %s26_s20, 128, %s28_s22, [#allocation4]  }
   0x6   :  { %s258_s26 = smov [#allocation6]   ;;  %s259_s28 = smov 128  }
   0x7   :  { %s37_s27 = sshll.u32 %s258_s26, 4  ;;  %s260_s29 = smov 8   ;;  %s38_s27 = int_to_ptr.vmem [resolvable:$true] %s37_s27 }
   0x8   :  { %43 = dma.hbm_to_vmem [thread:$0]  %s36_s25, 2048, %s38_s27, [#allocation7], %s259_s28, %s259_s28, %s260_s29  }
   0x9   :  { %249 = dma.done.wait [#allocation4], 128  }
   0xa   :  { %250 = vsyncadd [#allocation4], 4294967168 }
   0xb   :  { %251 = dma.done.wait [#allocation7], 2048  }
   0xc   :  { %252 = vsyncadd [#allocation7], 4294965248  ;;  %v74_v0 = vld [vmem:[#allocation6 + $0x78] sm:$0xff]  ;;  %v73_v1 = vld [vmem:[#allocation6 + $0x70] sm:$0xff]  ;;  %s261_s30 = smov [#allocation8]   ;;  %s118_s9 = sshll.u32 %s315_s4, 4  ;;  %v108_v19 = vstv %s311_s0  ;;  %s119_s9 = int_to_ptr.hbm [resolvable:$true] %s118_s9 }
   0xd   :  { %75 = vmatpush.xpose.msra.mxu0 %v74_v0  ;;  %v72_v2 = vld [vmem:[#allocation6 + $0x68] sm:$0xff]  ;;  %v71_v3 = vld [vmem:[#allocation6 + $0x60] sm:$0xff]  ;;  %v70_v4 = vld [vmem:[#allocation6 + $0x58] sm:$0xff]  ;;  %s116_s6 = sshll.u32 %s261_s30, 4  ;;  %s262_s12 = smov [#allocation9]   ;;  %s117_s6 = int_to_ptr.vmem [resolvable:$true] %s116_s6 }
   0xe   :  { %v69_v5 = vld [vmem:[#allocation6 + $0x50] sm:$0xff]  ;;  %v68_v6 = vld [vmem:[#allocation6 + $0x48] sm:$0xff]  ;;  %v67_v7 = vld [vmem:[#allocation6 + $0x40] sm:$0xff]  ;;  %s127_s13 = sshll.u32 %s262_s12, 4  ;;  %s129_s16 = sshll.u32 %s316_s5, 4  ;;  %s128_s13 = int_to_ptr.vmem [resolvable:$true] %s127_s13  ;;  %s130_s16 = int_to_ptr.hbm [resolvable:$true] %s129_s16 }
   0xf   :  { %v66_v8 = vld [vmem:[#allocation6 + $0x38] sm:$0xff]  ;;  %v65_v9 = vld [vmem:[#allocation6 + $0x30] sm:$0xff]  ;;  %v64_v10 = vld [vmem:[#allocation6 + $0x28] sm:$0xff] }
  0x10   :  { %v63_v11 = vld [vmem:[#allocation6 + $0x20] sm:$0xff]  ;;  %v62_v12 = vld [vmem:[#allocation6 + $0x18] sm:$0xff]  ;;  %v61_v13 = vld [vmem:[#allocation6 + $0x10] sm:$0xff] }
  0x11   :  { %76 = vmatpush.xpose.msra.mxu0 %v73_v1  ;;  %v60_v14 = vld [vmem:[#allocation6 + $0x8] sm:$0xff]  ;;  %v59_v15 = vld [vmem:[#allocation6] sm:$0xff]  ;;  %v58_v16 = vld [vmem:[#allocation3] sm:$0xff] }
  0x12   :  { %v152_v17 = vld [vmem:[%s312_s1] ss:$0 sm:$0xff] }
  0x15   :  { %77 = vmatpush.xpose.msra.mxu0 %v72_v2 }
  0x19   :  { %78 = vmatpush.xpose.msra.mxu0 %v71_v3 }
  0x1d   :  { %79 = vmatpush.xpose.msra.mxu0 %v70_v4 }
  0x21   :  { %80 = vmatpush.xpose.msra.mxu0 %v69_v5 }
  0x25   :  { %81 = vmatpush.xpose.msra.mxu0 %v68_v6 }
  0x29   :  { %82 = vmatpush.xpose.msra.mxu0 %v67_v7 }
  0x2d   :  { %83 = vmatpush.xpose.msra.mxu0 %v66_v8 }
  0x31   :  { %84 = vmatpush.xpose.msra.mxu0 %v65_v9 }
  0x35   :  { %85 = vmatpush.xpose.msra.mxu0 %v64_v10 }
  0x39   :  { %86 = vmatpush.xpose.msra.mxu0 %v63_v11 }
  0x3d   :  { %87 = vmatpush.xpose.msra.mxu0 %v62_v12 }
  0x41   :  { %88 = vmatpush.xpose.msra.mxu0 %v61_v13 }
  0x45   :  { %89 = vmatpush.xpose.msra.mxu0 %v60_v14 }
  0x49   :  { %90 = vmatpush.xpose.msra.mxu0 %v59_v15 }
  0x4c   :  { %91 = vmatmul.f32.vlgmr.msra.gmra.mxu0 %v58_v16 }
  0xc9   :  { %v92_v18 = vpop.f32.mrf.mxu0 }
  0xca   :  { %v105_v20 = vmul.f32 %v152_v17, %v92_v18 }
  0xcc   :  { %106 = vst [vmem:[#allocation8] sm:$0xff] %v105_v20  ;;  %v109_v21 = vmul.f32 %v108_v19, %v105_v20 }
  0xcd   :  { %121 = dma.vmem_to_hbm [thread:$0]  %s117_s6, 128, %s119_s9, [#allocation5]  }
  0xce   :  { %110 = vst [vmem:[#allocation9] sm:$0xff] %v109_v21 }
  0xcf   :  { %132 = dma.vmem_to_hbm [thread:$0]  %s128_s13, 128, %s130_s16, [#allocation10]  }
  0xd0   :  { %253 = dma.done.wait [#allocation5], 128  }
  0xd1   :  { %254 = vsyncadd [#allocation5], 4294967168 }
  0xd2   :  { %255 = dma.done.wait [#allocation10], 128  }
  0xd3   :  { %256 = vsyncadd [#allocation10], 4294967168 }
  0xd4   :  { %141 = vsyncpa [#allocation4], 1 }
  0xd5   :  { %142 = vsyncpa [#allocation7], 1 }
  0xd6   :  { %143 = vsyncpa [#allocation5], 1 }
  0xd7   :  { %144 = vsyncpa [#allocation10], 1 }

</bundles_post_ra>
